<compile_context>
chip_gen: v7x
topology: tpu7x:2x2x1
jax: 0.10.0
libtpu: 0.0.40
codegen_flags: <defaults>
</compile_context>

<pallas_src>
import functools

import jax
import jax.numpy as jnp
from jax import lax
from jax.experimental import pallas as pl
from jax.experimental.pallas import tpu as pltpu


def _round_up(x, m):
    return ((x + m - 1) // m) * m


def _triplet_partial_kernel(emb_ref, lab_ref, cls_ref, cnorm_ref, cid_ref,
                            out_ref, *, n_rows, positive_aggregator):
    emb = emb_ref[...]                 # (TM, D)    native dtype (f32/bf16)
    cls = cls_ref[...]                 # (C_pad, D) same dtype (resident)
    lab = lab_ref[...]                 # (TM, 1)    int32
    cnorm = cnorm_ref[...]             # (1, C_pad) f32 = ||cls_c||^2 (resident)
    cids = cid_ref[...]                # (1, C_pad) int32 class ids  (resident)

    tm = emb.shape[0]
    c_pad = cls.shape[0]

    # d2[i, c] = ||emb_i||^2 + ||cls_c||^2 - 2 emb_i . cls_c   (f32 accumulate)
    dot = lax.dot_general(emb, cls, (((1,), (1,)), ((), ())),
                          preferred_element_type=jnp.float32)     # (TM, C_pad)
    emb_f32 = emb.astype(jnp.float32)
    a2 = jnp.sum(emb_f32 * emb_f32, axis=-1, keepdims=True)       # (TM, 1)
    d2 = jnp.maximum(a2 + cnorm - 2.0 * dot, 0.0)                 # (TM, C_pad)

    # Mask rows past the end of the array in the (possibly partial) last tile
    # — the wrapper no longer pads embeddings in HBM.
    row_ids = pl.program_id(0) * tm + lax.broadcasted_iota(jnp.int32, (tm, 1), 0)
    valid = row_ids < n_rows                                      # (TM, 1)
    same = jnp.logical_and(lab == cids, valid)                    # (TM, C_pad)

    # positive_dists = d2 * mask  (identical to where(same, d2, 0) since d2>=0)
    pos_contrib = jnp.where(same, d2, 0.0)
    if positive_aggregator == 'max':
        pos_part = jnp.max(pos_contrib, axis=0, keepdims=True)    # (1, C_pad)
    else:  # 'sum'
        pos_part = jnp.sum(pos_contrib, axis=0, keepdims=True)
    cnt_part = jnp.sum(same.astype(jnp.float32), axis=0, keepdims=True)

    # Pack both partials into one unmasked 8-sublane store (rows 2..7 = 0).
    row_sel = lax.broadcasted_iota(jnp.int32, (8, c_pad), 0)
    packed = (jnp.where(row_sel == 0, pos_part, 0.0)
              + jnp.where(row_sel == 1, cnt_part, 0.0))           # (8, C_pad)
    out_ref[...] = packed.reshape(out_ref.shape)


def triplet_loss(embeddings, labels, label_embedding_matrix,
                 margin=1.0, positive_aggregator='max', tile_rows=None):
    """Pallas TPU implementation of TripletLoss.forward."""
    if positive_aggregator not in ('max', 'sum'):
        raise NotImplementedError(
            'positive_aggregator should be one of the following: "max", "sum"')

    n, d = embeddings.shape
    c = label_embedding_matrix.shape[0]
    dtype = embeddings.dtype
    itemsize = jnp.dtype(dtype).itemsize

    # Lane-pad the class dimension to a multiple of 128 (padded classes never
    # match a real label -> zero count -> zero contribution).
    c_pad = max(128, _round_up(c, 128))
    cls = jnp.zeros((c_pad, d), dtype).at[:c].set(
        label_embedding_matrix.astype(dtype))
    cnorm = jnp.zeros((1, c_pad), jnp.float32).at[0, :c].set(
        jnp.sum(jnp.square(label_embedding_matrix.astype(jnp.float32)), axis=-1))
    cids = jnp.arange(c_pad, dtype=jnp.int32).reshape(1, c_pad)

    # Row tile: as large as possible (<= 512) while double-buffered embedding
    # tiles + resident class data + f32 temporaries stay well under the 32 MiB
    # scoped-VMEM limit (safe on v5e/v6e/v7x).
    def footprint(t):
        return (2 * t * d * itemsize           # emb tile (double-buffered)
                + 2 * t * 4                    # label tile (double-buffered)
                + 2 * c_pad * d * itemsize     # resident class matrix (x2 bufs)
                + 4 * c_pad * 4                # resident cnorm / cids (x2 bufs)
                + 2 * 8 * c_pad * 4            # packed output block (x2 bufs)
                + 4 * t * c_pad * 4)           # d2 / mask / select f32 temps

    if tile_rows is None:
        tm = min(512, _round_up(n, 8))
        while tm > 8 and footprint(tm) > 24 * 1024 * 1024:
            tm = _round_up(tm // 2, 8)
    else:
        tm = _round_up(min(tile_rows, _round_up(n, 8)), 8)
    g = -(-n // tm)

    lab = labels.astype(jnp.int32).reshape(n, 1)

    kernel = functools.partial(_triplet_partial_kernel, n_rows=n,
                               positive_aggregator=positive_aggregator)

    out = pl.pallas_call(
        kernel,
        grid=(g,),
        in_specs=[
            pl.BlockSpec((tm, d), lambda i: (i, 0)),       # embeddings tile
            pl.BlockSpec((tm, 1), lambda i: (i, 0)),       # int32 labels tile
            pl.BlockSpec((c_pad, d), lambda i: (0, 0)),    # resident class emb
            pl.BlockSpec((1, c_pad), lambda i: (0, 0)),    # resident ||cls||^2
            pl.BlockSpec((1, c_pad), lambda i: (0, 0)),    # resident class ids
        ],
        out_specs=pl.BlockSpec((1, 8, c_pad), lambda i: (i, 0, 0)),
        out_shape=jax.ShapeDtypeStruct((g, 8, c_pad), jnp.float32),
        compiler_params=pltpu.CompilerParams(
            dimension_semantics=("parallel",),
            # 32 MiB fits every generation; raise toward 64-96 MiB on
            # v5e/v6e (and keep <= ~48 MiB on v7x) if larger tiles are needed.
            vmem_limit_bytes=32 * 1024 * 1024),
    )(embeddings, lab, cls, cnorm, cids)

    # Tiny (G, C_pad) cross-tile combine + final relu-sum (pure-JAX glue).
    pos_parts = out[:, 0, :]
    cnt_parts = out[:, 1, :]
    if positive_aggregator == 'max':
        pos_c = jnp.max(pos_parts, axis=0)
    else:
        pos_c = jnp.sum(pos_parts, axis=0)
    cnt_c = jnp.sum(cnt_parts, axis=0)

    # Reference negative term is identically zero (mask[j, j] == 1 for every
    # column j and d2 >= 0), so loss == sum_c count_c * relu(pos_c + margin).
    return jnp.sum(cnt_c * jnp.maximum(pos_c + margin, 0.0))


def triplet_loss_ref(embeddings, labels, label_embedding_matrix,
                     margin=1.0, positive_aggregator='max'):
    """Pure-JAX reference mirroring the PyTorch module (incl. the neg term)."""
    lemb = label_embedding_matrix[labels]
    diff = embeddings[:, None, :] - lemb[None, :, :]
    d2 = jnp.sum(diff * diff, axis=-1)
    mask = (labels[:, None] == labels[None, :]).astype(jnp.float32)
    if positive_aggregator == 'max':
        pos = jnp.max(d2 * mask, axis=0)
    else:
        pos = jnp.sum(d2 * mask, axis=0)
    neg = jnp.min(d2 * (1.0 - mask), axis=0)
    return jnp.sum(jnp.maximum(pos - neg + margin, 0.0))


if __name__ == "__main__":
    N, D, NUM_CLASSES = 37, 32, 5
    key = jax.random.PRNGKey(0)
    k_emb, k_lab, k_le = jax.random.split(key, 3)

    embeddings = jax.random.normal(k_emb, (N, D), dtype=jnp.float32)
    labels = jax.random.randint(k_lab, (N,), 0, NUM_CLASSES, dtype=jnp.int32)
    label_embedding = jax.random.normal(k_le, (NUM_CLASSES, D), dtype=jnp.float32)

    for agg in ('max', 'sum'):
        # tile_rows=None: single tile.  tile_rows=16: multi-tile grid with a
        # partial (in-kernel masked) last tile.
        for tile_rows in (None, 16):
            loss = triplet_loss(embeddings, labels, label_embedding,
                                margin=1.0, positive_aggregator=agg,
                                tile_rows=tile_rows)
            loss = jax.block_until_ready(loss)
            loss_ref = triplet_loss_ref(embeddings, labels, label_embedding,
                                        margin=1.0, positive_aggregator=agg)
            assert jnp.allclose(loss, loss_ref, rtol=1e-4, atol=1e-4), (
                agg, tile_rows, loss, loss_ref)

    print("KERNEL_OK")
</pallas_src>

<mosaic_0001>
module attributes {stable_mosaic.version = 11 : i64} {
  func.func @_triplet_partial_kernel(%arg0: i32, %arg1: memref<40x32xf32, #tpu.memory_space<vmem>>, %arg2: memref<40x1xi32, #tpu.memory_space<vmem>>, %arg3: memref<128x32xf32, #tpu.memory_space<vmem>>, %arg4: memref<1x128xf32, #tpu.memory_space<vmem>>, %arg5: memref<1x128xi32, #tpu.memory_space<vmem>>, %arg6: memref<1x8x128xf32, #tpu.memory_space<vmem>>) attributes {dimension_semantics = [#tpu.dimension_semantics<parallel>], iteration_bounds = array<i64: 1>, scalar_prefetch = 0 : i64, scratch_operands = 0 : i64, tpu.core_type = #tpu.core_type<tc>, window_params = [{transform_indices = @transform_0, window_bounds = array<i64: 40, 32>}, {transform_indices = @transform_1, window_bounds = array<i64: 40, 1>}, {pipeline_mode = #tpu.pipeline_mode<synchronous>, transform_indices = @transform_2, window_bounds = array<i64: 128, 32>}, {pipeline_mode = #tpu.pipeline_mode<synchronous>, transform_indices = @transform_3, window_bounds = array<i64: 1, 128>}, {pipeline_mode = #tpu.pipeline_mode<synchronous>, transform_indices = @transform_4, window_bounds = array<i64: 1, 128>}, {transform_indices = @transform_5, window_bounds = array<i64: 1, 8, 128>}]} {
    %c0 = arith.constant 0 : index
    %c0_0 = arith.constant 0 : index
    %0 = vector.load %arg1[%c0, %c0_0] : memref<40x32xf32, #tpu.memory_space<vmem>>, vector<40x32xf32>
    %c0_1 = arith.constant 0 : index
    %c0_2 = arith.constant 0 : index
    %1 = vector.load %arg3[%c0_1, %c0_2] : memref<128x32xf32, #tpu.memory_space<vmem>>, vector<128x32xf32>
    %c0_3 = arith.constant 0 : index
    %c0_4 = arith.constant 0 : index
    %2 = vector.load %arg2[%c0_3, %c0_4] : memref<40x1xi32, #tpu.memory_space<vmem>>, vector<40x1xi32>
    %c0_5 = arith.constant 0 : index
    %c0_6 = arith.constant 0 : index
    %3 = vector.load %arg4[%c0_5, %c0_6] : memref<1x128xf32, #tpu.memory_space<vmem>>, vector<1x128xf32>
    %c0_7 = arith.constant 0 : index
    %c0_8 = arith.constant 0 : index
    %4 = vector.load %arg5[%c0_7, %c0_8] : memref<1x128xi32, #tpu.memory_space<vmem>>, vector<1x128xi32>
    %cst = arith.constant dense<0.000000e+00> : vector<40x128xf32>
    %5 = tpu.matmul %0, %1, %cst {dimension_numbers = #tpu.dot_dimension_numbers<[1], [1], [0], [0], [0, 0, 1, 0], [], []>} : vector<40x32xf32>, vector<128x32xf32>, vector<40x128xf32> -> vector<40x128xf32>
    %6 = arith.mulf %0, %0 : vector<40x32xf32>
    %cst_9 = arith.constant dense<0.000000e+00> : vector<40xf32>
    %7 = vector.multi_reduction <add>, %6, %cst_9 [1] : vector<40x32xf32> to vector<40xf32>
    %8 = vector.shape_cast %7 : vector<40xf32> to vector<40x1xf32>
    %9 = vector.broadcast %8 : vector<40x1xf32> to vector<40x128xf32>
    %10 = vector.broadcast %3 : vector<1x128xf32> to vector<40x128xf32>
    %11 = arith.addf %9, %10 : vector<40x128xf32>
    %cst_10 = arith.constant 2.000000e+00 : f32
    %12 = vector.broadcast %cst_10 : f32 to vector<40x128xf32>
    %13 = arith.mulf %12, %5 : vector<40x128xf32>
    %14 = arith.subf %11, %13 : vector<40x128xf32>
    %cst_11 = arith.constant 0.000000e+00 : f32
    %15 = vector.broadcast %cst_11 : f32 to vector<40x128xf32>
    %16 = arith.maximumf %14, %15 : vector<40x128xf32>
    %c40_i32 = arith.constant 40 : i32
    %17 = arith.muli %arg0, %c40_i32 : i32
    %18 = tpu.iota {dimensions = array<i32: 0>} : vector<40x1xi32>
    %19 = vector.broadcast %17 : i32 to vector<40x1xi32>
    %20 = arith.addi %19, %18 : vector<40x1xi32>
    %c37_i32 = arith.constant 37 : i32
    %21 = vector.broadcast %c37_i32 : i32 to vector<40x1xi32>
    %22 = arith.cmpi slt, %20, %21 : vector<40x1xi32>
    %23 = vector.broadcast %2 : vector<40x1xi32> to vector<40x128xi32>
    %24 = vector.broadcast %4 : vector<1x128xi32> to vector<40x128xi32>
    %25 = arith.cmpi eq, %23, %24 : vector<40x128xi32>
    %26 = vector.broadcast %22 : vector<40x1xi1> to vector<40x128xi1>
    %27 = arith.andi %25, %26 : vector<40x128xi1>
    %cst_12 = arith.constant 0.000000e+00 : f32
    %28 = vector.broadcast %cst_12 : f32 to vector<40x128xf32>
    %29 = arith.select %27, %16, %28 : vector<40x128xi1>, vector<40x128xf32>
    %cst_13 = arith.constant dense<0xFF800000> : vector<128xf32>
    %30 = vector.multi_reduction <maximumf>, %29, %cst_13 [0] : vector<40x128xf32> to vector<128xf32>
    %31 = vector.shape_cast %30 : vector<128xf32> to vector<1x128xf32>
    %32 = arith.extui %27 : vector<40x128xi1> to vector<40x128xi32>
    %33 = arith.sitofp %32 : vector<40x128xi32> to vector<40x128xf32>
    %cst_14 = arith.constant dense<0.000000e+00> : vector<128xf32>
    %34 = vector.multi_reduction <add>, %33, %cst_14 [0] : vector<40x128xf32> to vector<128xf32>
    %35 = vector.shape_cast %34 : vector<128xf32> to vector<1x128xf32>
    %36 = tpu.iota {dimensions = array<i32: 0>} : vector<8x128xi32>
    %c0_i32 = arith.constant 0 : i32
    %37 = vector.broadcast %c0_i32 : i32 to vector<8x128xi32>
    %38 = arith.cmpi eq, %36, %37 : vector<8x128xi32>
    %cst_15 = arith.constant 0.000000e+00 : f32
    %39 = vector.shape_cast %31 : vector<1x128xf32> to vector<1x128xf32>
    %40 = vector.broadcast %39 : vector<1x128xf32> to vector<8x128xf32>
    %41 = vector.broadcast %cst_15 : f32 to vector<8x128xf32>
    %42 = arith.select %38, %40, %41 : vector<8x128xi1>, vector<8x128xf32>
    %c1_i32 = arith.constant 1 : i32
    %43 = vector.broadcast %c1_i32 : i32 to vector<8x128xi32>
    %44 = arith.cmpi eq, %36, %43 : vector<8x128xi32>
    %cst_16 = arith.constant 0.000000e+00 : f32
    %45 = vector.shape_cast %35 : vector<1x128xf32> to vector<1x128xf32>
    %46 = vector.broadcast %45 : vector<1x128xf32> to vector<8x128xf32>
    %47 = vector.broadcast %cst_16 : f32 to vector<8x128xf32>
    %48 = arith.select %44, %46, %47 : vector<8x128xi1>, vector<8x128xf32>
    %49 = arith.addf %42, %48 : vector<8x128xf32>
    %50 = vector.shape_cast %49 : vector<8x128xf32> to vector<1x8x128xf32>
    %c0_17 = arith.constant 0 : index
    %c0_18 = arith.constant 0 : index
    %c0_19 = arith.constant 0 : index
    %51 = vector.load %arg6[%c0_17, %c0_18, %c0_19] : memref<1x8x128xf32, #tpu.memory_space<vmem>>, vector<1x8x128xf32>
    tpu.vector_store %arg6[%c0_17, %c0_18, %c0_19], %50 {strides = array<i32>} : memref<1x8x128xf32, #tpu.memory_space<vmem>>, vector<1x8x128xf32>,
    return
  }
  func.func @transform_0(%arg0: i32) -> (i32, i32) {
    %c0_i32 = arith.constant 0 : i32
    %c0_i32_0 = arith.constant 0 : i32
    return %arg0, %c0_i32 : i32, i32
  }
  func.func @transform_1(%arg0: i32) -> (i32, i32) {
    %c0_i32 = arith.constant 0 : i32
    %c0_i32_0 = arith.constant 0 : i32
    return %arg0, %c0_i32 : i32, i32
  }
  func.func @transform_2(%arg0: i32) -> (i32, i32) {
    %c0_i32 = arith.constant 0 : i32
    %c0_i32_0 = arith.constant 0 : i32
    %c0_i32_1 = arith.constant 0 : i32
    return %c0_i32, %c0_i32_0 : i32, i32
  }
  func.func @transform_3(%arg0: i32) -> (i32, i32) {
    %c0_i32 = arith.constant 0 : i32
    %c0_i32_0 = arith.constant 0 : i32
    %c0_i32_1 = arith.constant 0 : i32
    return %c0_i32, %c0_i32_0 : i32, i32
  }
  func.func @transform_4(%arg0: i32) -> (i32, i32) {
    %c0_i32 = arith.constant 0 : i32
    %c0_i32_0 = arith.constant 0 : i32
    %c0_i32_1 = arith.constant 0 : i32
    return %c0_i32, %c0_i32_0 : i32, i32
  }
  func.func @transform_5(%arg0: i32) -> (i32, i32, i32) {
    %c0_i32 = arith.constant 0 : i32
    %c0_i32_0 = arith.constant 0 : i32
    %c0_i32_1 = arith.constant 0 : i32
    return %arg0, %c0_i32, %c0_i32_0 : i32, i32, i32
  }
}

</mosaic_0001>

<bundles_post_ra>
// kernel: tpu_custom_call.1
= control target key start
LH: loop header
LB: loop body
LE: loop exit
PB: predicated region body
PF: predicated region fallthrough
CT: control target
= control target key end

     0   :  { %vm49_vm0 = vcmask 261120   ;;  %v536_v2 = vmov 0.0|0.0   ;;  %vm537_vm2 = vmmov 0   ;;  %v538_v5 = vmov 0.0   ;;  %s807_s0 = inlined_call_operand.vmem [shape: f32[37,32], index: 0, kind: input, shape index: {}]   ;;  %s808_s1 = inlined_call_operand.vmem [shape: s32[37,1], index: 1, kind: input, shape index: {}]   ;;  %s809_s2 = inlined_call_operand.vmem [shape: f32[128,32], index: 2, kind: input, shape index: {}]   ;;  %s810_s3 = inlined_call_operand.vmem [shape: f32[1,128], index: 3, kind: input, shape index: {}]   ;;  %s811_s4 = inlined_call_operand.vmem [shape: s32[1,128], index: 4, kind: input, shape index: {}]   ;;  %s812_s5 = inlined_call_operand.hbm [shape: f32[1,8,128], index: 5, kind: output, shape index: {}]  }
   0x1   :  { %v26_v0 = vld [vmem:[%s809_s2] sm:$0xff]  ;;  %v27_v1 = vld [vmem:[%s809_s2 + $0x8] sm:$0xff]  ;;  %457 = vmatprep.subr.bf16.mxu0 %v536_v2  ;;  %489 = vmatprep.subr.bf16.mxu1 %v536_v2  ;;  %vm581_vm1 = vmpackc.low %vm49_vm0, %vm49_vm0  ;;  %v539_v9 = vmov 0  }
   0x2   :  { %v458_v3 = vpack.c.bf16 %v27_v1, %v26_v0  ;;  %442 = vmatprep.mubr.msk.f32.mxu0 %vm537_vm2, %v538_v5  ;;  %451 = vmatprep.mubr.msk.f32.mxu1 %vm537_vm2, %v538_v5  ;;  %v28_v6 = vld [vmem:[%s809_s2 + $0x10] sm:$0xff]  ;;  %v29_v7 = vld [vmem:[%s809_s2 + $0x18] sm:$0xff]  ;;  %v604_v8 = vld [vmem:[%s807_s0] sm:$0xff] }
   0x3   :  { %510 = vset.pattern.permute.xlu1 %v539_v9  ;;  %511 = vset.pattern.permute.xlu0 %v539_v9  ;;  %v609_v10 = vld [vmem:[%s807_s0 + $0x8] sm:$0xff]  ;;  %v614_v11 = vld [vmem:[%s807_s0 + $0x20] sm:$0xff]  ;;  %v203_v12 = vmul.f32 %v604_v8, %v604_v8  ;;  %v462_v13 = vpack.c.bf16 %v29_v7, %v28_v6  ;;  %v621_v14 = vld [vmem:[%s807_s0 + $0x10] sm:$0xff] }
   0x4   :  { %460 = vmatpush3.bf16.xpose.msk.msra.mxu0 %vm581_vm1, %v458_v3  ;;  %497 = vmatpush3.bf16.xpose.msk.msra.mxu1 %vm581_vm1, %v458_v3  ;;  %v204_v15 = vmul.f32 %v609_v10, %v609_v10  ;;  %v207_v16 = vmul.f32 %v614_v11, %v614_v11  ;;  %v205_v18 = vmul.f32 %v621_v14, %v621_v14  ;;  %v633_v19 = vld [vmem:[%s807_s0 + $0x18] sm:$0xff] }
   0x5   :  { %461 = vmatprep.subr.bf16.mxu0 %v536_v2  ;;  %490 = vmatprep.subr.bf16.mxu1 %v536_v2  ;;  %v208_v17 = vsel %vm49_vm0, %v203_v12, 0.0  ;;  %v206_v22 = vmul.f32 %v633_v19, %v633_v19 }
   0x6   :  { %v211_v20 = vsel %vm49_vm0, %v204_v15, 0.0  ;;  %209 = vadd.xlane.f32.xlu0 %v208_v17  ;;  %v220_v21 = vsel %vm49_vm0, %v207_v16, 0.0 }
   0x7   :  { %212 = vadd.xlane.f32.xlu1 %v211_v20 }
   0x8   :  { %10 = vsyncpa [#allocation3], 0  ;;  %v214_v23 = vsel %vm49_vm0, %v205_v18, 0.0  ;;  %v30_v24 = vld [vmem:[%s809_s2 + $0x20] sm:$0xff]  ;;  %v31_v25 = vld [vmem:[%s809_s2 + $0x28] sm:$0xff]  ;;  %v217_v26 = vsel %vm49_vm0, %v206_v22, 0.0  ;;  %v250_v56 = vlaneseq }
   0x9   :  { %v466_v27 = vpack.c.bf16 %v31_v25, %v30_v24  ;;  %v32_v28 = vld [vmem:[%s809_s2 + $0x30] sm:$0xff]  ;;  %v33_v29 = vld [vmem:[%s809_s2 + $0x38] sm:$0xff]  ;;  %v34_v31 = vld [vmem:[%s809_s2 + $0x40] sm:$0xff] }
   0xa   :  { %221 = vadd.xlane.f32.xlu0 %v220_v21  ;;  %v470_v30 = vpack.c.bf16 %v33_v29, %v32_v28  ;;  %v35_v32 = vld [vmem:[%s809_s2 + $0x48] sm:$0xff]  ;;  %v42_v33 = vld [vmem:[%s808_s1] sm:$0xff]  ;;  %v36_v36 = vld [vmem:[%s809_s2 + $0x50] sm:$0xff]  ;;  %v755_v59 = vshrl.u32 %v250_v56, 7 }
   0xb   :  { %215 = vadd.xlane.f32.xlu1 %v214_v23  ;;  %v474_v34 = vpack.c.bf16 %v35_v32, %v34_v31  ;;  %v46_v35 = vld [vmem:[%s808_s1 + $0x20] sm:$0xff]  ;;  %v37_v37 = vld [vmem:[%s809_s2 + $0x58] sm:$0xff]  ;;  %v43_v38 = vld [vmem:[%s808_s1 + $0x8] sm:$0xff] }
   0xc   :  { %464 = vmatpush3.bf16.xpose.msk.msra.mxu0 %vm581_vm1, %v462_v13  ;;  %498 = vmatpush3.bf16.xpose.msk.msra.mxu1 %vm581_vm1, %v462_v13  ;;  %v44_v39 = vld [vmem:[%s808_s1 + $0x10] sm:$0xff]  ;;  %v478_v40 = vpack.c.bf16 %v37_v37, %v36_v36  ;;  %v45_v41 = vld [vmem:[%s808_s1 + $0x18] sm:$0xff]  ;;  %v38_v42 = vld [vmem:[%s809_s2 + $0x60] sm:$0xff]  ;;  %v255_v62 = vadd.s32 32, %v755_v59  ;;  %vm341_vm10 = vcmp.eq.s32.totalorder %v755_v59, 0  ;;  %vm343_vm11 = vcmp.eq.s32.totalorder %v755_v59, 1 }
   0xd   :  { %465 = vmatprep.subr.bf16.mxu0 %v536_v2  ;;  %491 = vmatprep.subr.bf16.mxu1 %v536_v2  ;;  %v39_v43 = vld [vmem:[%s809_s2 + $0x68] sm:$0xff]  ;;  %v40_v45 = vld [vmem:[%s809_s2 + $0x70] sm:$0xff]  ;;  %v41_v46 = vld [vmem:[%s809_s2 + $0x78] sm:$0xff] }
   0xe   :  { %218 = vadd.xlane.f32.xlu0 %v217_v26  ;;  %v482_v44 = vpack.c.bf16 %v39_v43, %v38_v42  ;;  %v486_v47 = vpack.c.bf16 %v41_v46, %v40_v45  ;;  %v751_v55 = vld [vmem:[%s811_s4] ss:$0 sm:$0xff]  ;;  %vm266_vm7 = vcmp.lt.s32.totalorder %v255_v62, 37 }
   0xf   :  { %v382_v4 = vld [vmem:[%s810_s3] ss:$0 sm:$0xff]  ;;  %s540_s3 = smov [#allocation2]  }
  0x10   :  { %s353_s19 = sshll.u32 %s540_s3, 4  ;;  %s354_s19 = int_to_ptr.vmem [resolvable:$true] %s353_s19 }
  0x11   :  { %s512_s20 = scalar_lea.vmem %s354_s19, 128  ;;  %p517_p1 = scmp.lt.s32.totalorder %s354_s19, %s354_s19 }
  0x12   :  { %p513_p0 = scmp.ne.s32.totalorder %s354_s19, %s512_s20  ;;  %p518_p2 = scmp.lt.s32.totalorder %s512_s20, %s512_s20 }
  0x14   :  { %468 = vmatpush3.bf16.xpose.msk.msra.mxu0 %vm581_vm1, %v466_v27  ;;  %499 = vmatpush3.bf16.xpose.msk.msra.mxu1 %vm581_vm1, %v466_v27  ;;  %p519_p3 = por %p518_p2, %p517_p1 }
  0x15   :  { %469 = vmatprep.subr.bf16.mxu0 %v536_v2  ;;  %492 = vmatprep.subr.bf16.mxu1 %v536_v2 }
  0x16   :  { %p520_p4 = pnand %p519_p3, %p513_p0 }
  0x1c   :  { %472 = vmatpush3.bf16.xpose.msk.msra.mxu0 %vm581_vm1, %v470_v30  ;;  %500 = vmatpush3.bf16.xpose.msk.msra.mxu1 %vm581_vm1, %v470_v30 }
  0x1d   :  { %473 = vmatprep.subr.bf16.mxu0 %v536_v2  ;;  %493 = vmatprep.subr.bf16.mxu1 %v536_v2 }
  0x1e   :  { %268 = vperm.xlu1 %510, %v42_v33  }
  0x22   :  { %280 = vperm.xlu1 %510, %v46_v35  }
  0x24   :  { %476 = vmatpush3.bf16.xpose.msk.msra.mxu0 %vm581_vm1, %v474_v34  ;;  %501 = vmatpush3.bf16.xpose.msk.msra.mxu1 %vm581_vm1, %v474_v34 }
  0x25   :  { %477 = vmatprep.subr.bf16.mxu0 %v536_v2  ;;  %494 = vmatprep.subr.bf16.mxu1 %v536_v2 }
  0x26   :  { %271 = vperm.xlu0 %511, %v43_v38   ;;  %274 = vperm.xlu1 %510, %v44_v39  }
  0x2a   :  { %277 = vperm.xlu1 %510, %v45_v41  }
  0x2c   :  { %480 = vmatpush3.bf16.xpose.msk.msra.mxu0 %vm581_vm1, %v478_v40  ;;  %502 = vmatpush3.bf16.xpose.msk.msra.mxu1 %vm581_vm1, %v478_v40 }
  0x2d   :  { %481 = vmatprep.subr.bf16.mxu0 %v536_v2  ;;  %495 = vmatprep.subr.bf16.mxu1 %v536_v2 }
  0x34   :  { %484 = vmatpush3.bf16.xpose.msk.msra.mxu0 %vm581_vm1, %v482_v44  ;;  %503 = vmatpush3.bf16.xpose.msk.msra.mxu1 %vm581_vm1, %v482_v44 }
  0x35   :  { %485 = vmatprep.subr.bf16.mxu0 %v536_v2  ;;  %496 = vmatprep.subr.bf16.mxu1 %v536_v2 }
  0x3c   :  { %488 = vmatpush3.bf16.xpose.msk.msra.mxu0 %vm581_vm1, %v486_v47  ;;  %504 = vmatpush3.bf16.xpose.msk.msra.mxu1 %vm581_vm1, %v486_v47 }
  0x43   :  { %443 = vmatmul.mubr.msk.f32.vlgmr.msra.gmra.mrb[0].mxu0 %vm49_vm0, %v604_v8  ;;  %452 = vmatmul.mubr.msk.f32.vlgmr.msra.gmra.mrb[0].mxu1 %vm49_vm0, %v633_v19 }
  0x44   :  { %445 = vmatprep.mubr.msk.f32.mxu0 %vm537_vm2, %v538_v5  ;;  %454 = vmatprep.mubr.msk.f32.mxu1 %vm537_vm2, %v538_v5 }
  0x47   :  { %446 = vmatmul.mubr.msk.f32.gmra.mrb[2].mxu0 %vm49_vm0, %v609_v10  ;;  %455 = vmatmul.mubr.msk.f32.gmra.mrb[2].mxu1 %vm49_vm0, %v614_v11 }
  0x48   :  { %448 = vmatprep.mubr.msk.f32.mxu0 %vm537_vm2, %v538_v5 }
  0x4b   :  { %449 = vmatmul.mubr.msk.f32.gmra.mrb[4].mxu0 %vm49_vm0, %v621_v14 }
  0x93   :  { %v210_v49 = vpop.xlane.xlu0 %209 }
  0x94   :  { %v213_v48 = vpop.xlane.xlu1 %212  ;;  %v229_v10 = vadd.f32 %v382_v4, %v210_v49 }
  0x95   :  { %v230_v21 = vadd.f32 %v382_v4, %v213_v48 }
  0x97   :  { %v222_v51 = vpop.xlane.xlu0 %221 }
  0x98   :  { %v216_v50 = vpop.xlane.xlu1 %215  ;;  %v233_v22 = vadd.f32 %v382_v4, %v222_v51 }
  0x99   :  { %v231_v32 = vadd.f32 %v382_v4, %v216_v50 }
  0x9b   :  { %v219_v53 = vpop.xlane.xlu0 %218 }
  0x9c   :  { %v232_v15 = vadd.f32 %v382_v4, %v219_v53 }
  0x9d   :  { %v269_v52 = vpop.permute.xlu1 %268 }
  0x9e   :  { %vm286_vm3 = vcmp.eq.s32.totalorder %v269_v52, %v751_v55 }
  0x9f   :  { %v384_v60 = vsel %vm286_vm3, 1.0, %v538_v5 }
  0xa1   :  { %v281_v54 = vpop.permute.xlu1 %280 }
  0xa2   :  { %vm290_vm8 = vcmp.eq.s32.totalorder %v281_v54, %v751_v55 }
  0xa3   :  { %vm776_vm9 = vmand %vm290_vm8, %vm266_vm7 }
  0xa4   :  { %v388_v11 = vsel %vm776_vm9, 1.0, %v538_v5 }
  0xa5   :  { %v272_v57 = vpop.permute.xlu0 %271  ;;  %v275_v58 = vpop.permute.xlu1 %274 }
  0xa6   :  { %vm287_vm4 = vcmp.eq.s32.totalorder %v272_v57, %v751_v55  ;;  %vm288_vm5 = vcmp.eq.s32.totalorder %v275_v58, %v751_v55 }
  0xa7   :  { %v385_v61 = vsel %vm287_vm4, 1.0, %v538_v5  ;;  %v386_v1 = vsel %vm288_vm5, 1.0, %v538_v5 }
  0xa8   :  { %v331_v0 = vadd.f32 %v385_v61, %v384_v60 }
  0xa9   :  { %v278_v63 = vpop.permute.xlu1 %277 }
  0xaa   :  { %vm289_vm6 = vcmp.eq.s32.totalorder %v278_v63, %v751_v55  ;;  %v332_v2 = vadd.f32 %v386_v1, %v331_v0 }
  0xab   :  { %v387_v3 = vsel %vm289_vm6, 1.0, %v538_v5 }
  0xac   :  { %v333_v7 = vadd.f32 %v387_v3, %v332_v2 }
  0xae   :  { %v334_v18 = vadd.f32 %v388_v11, %v333_v7 }
  0xb0   :  { %v335_v5 = vrot.slane %v334_v18, 4 }
  0xb2   :  { %v336_v41 = vadd.f32 %v335_v5, %v334_v18 }
  0xb4   :  { %v337_v48 = vrot.slane %v336_v41, 2 }
  0xb6   :  { %v338_v52 = vadd.f32 %v337_v48, %v336_v41 }
  0xb8   :  { %v339_v56 = vrot.slane %v338_v52, 1 }
  0xba   :  { %v340_v57 = vadd.f32 %v339_v56, %v338_v52 }
  0xbc   :  { %v344_v58 = vsel %vm343_vm11, %v340_v57, 0.0 }
 0x116   :  { %v179_v8 = vpop.f32.mrb[0].mxu0  ;;  %v194_v9 = vpop.f32.mrb[0].mxu1 }
 0x117   :  { %v234_v12 = vmul.f32 2.0, %v179_v8  ;;  %v444_v13 = vpop.f32.mrb[1].mxu0  ;;  %v453_v14 = vpop.f32.mrb[1].mxu1  ;;  %v237_v17 = vmul.f32 2.0, %v194_v9 }
 0x119   :  { %v239_v16 = vsub.f32 %v229_v10, %v234_v12  ;;  %v242_v28 = vsub.f32 %v232_v15, %v237_v17 }
 0x11a   :  { %v184_v19 = vpop.f32.mrb[2].mxu0  ;;  %v199_v20 = vpop.f32.mrb[2].mxu1 }
 0x11b   :  { %v235_v23 = vmul.f32 2.0, %v184_v19  ;;  %v238_v24 = vmul.f32 2.0, %v199_v20  ;;  %v447_v25 = vpop.f32.mrb[3].mxu0  ;;  %v456_v26 = vpop.f32.mrb[3].mxu1  ;;  %v244_v27 = vmax.f32 %v239_v16, 0.0  ;;  %v247_v38 = vmax.f32 %v242_v28, 0.0 }
 0x11d   :  { %v240_v29 = vsub.f32 %v230_v21, %v235_v23  ;;  %v243_v30 = vsub.f32 %v233_v22, %v238_v24  ;;  %v306_v37 = vsel %vm286_vm3, %v244_v27, 0.0  ;;  %v309_v46 = vsel %vm289_vm6, %v247_v38, 0.0 }
 0x11e   :  { %v189_v31 = vpop.f32.mrb[4].mxu0 }
 0x11f   :  { %v245_v33 = vmax.f32 %v240_v29, 0.0  ;;  %v248_v34 = vmax.f32 %v243_v30, 0.0  ;;  %v236_v35 = vmul.f32 2.0, %v189_v31  ;;  %v450_v36 = vpop.f32.mrb[5].mxu0 }
 0x121   :  { %v310_v39 = vsel %vm776_vm9, %v248_v34, 0.0  ;;  %v241_v40 = vsub.f32 %v231_v32, %v236_v35  ;;  %v307_v43 = vsel %vm287_vm4, %v245_v33, 0.0 }
 0x122   :  { %v311_v42 = vmax.f32 %v306_v37, %v310_v39 }
 0x123   :  { %v246_v44 = vmax.f32 %v241_v40, 0.0 }
 0x124   :  { %v312_v45 = vmax.f32 %v311_v42, %v307_v43 }
 0x125   :  { %v308_v47 = vsel %vm288_vm5, %v246_v44, 0.0 }
 0x126   :  { %v313_v49 = vmax.f32 %v308_v47, %v309_v46 }
 0x128   :  { %v314_v50 = vmax.f32 %v312_v45, %v313_v49 }
 0x12a   :  { %v315_v51 = vrot.slane %v314_v50, 4 }
 0x12c   :  { %v316_v53 = vmax.f32 %v314_v50, %v315_v51 }
 0x12e   :  { %v317_v54 = vrot.slane %v316_v53, 2 }
 0x130   :  { %v318_v60 = vmax.f32 %v316_v53, %v317_v54 }
 0x132   :  { %v319_v61 = vrot.slane %v318_v60, 1 }
 0x134   :  { %v320_v62 = vmax.f32 %v318_v60, %v319_v61 }
 0x136   :  { %v342_v55 = vsel %vm341_vm10, %v320_v62, 0.0 }
 0x137   :  { %v345_v63 = vadd.f32 %v344_v58, %v342_v55 }
 0x139   :  { %346 = vst [vmem:[#allocation2] sm:$0xff] %v345_v63 }
 0x13a   :  { %523 = shalt.err (!%p520_p4)
}
 0x13b   :  { %s524_s23 = scalar_lea.hbm %s812_s5, 128 }
 0x13c   :  { %p525_p5 = scmp.ne.s32.totalorder %s812_s5, %s524_s23  ;;  %p528_p6 = scmp.lt.u32.totalorder %s524_s23, %s812_s5 }
 0x13e   :  { %p530_p7 = pnand %p528_p6, %p525_p5 }
 0x140   :  { %533 = shalt.err (!%p530_p7)
}
 0x141   :  { %356 = dma.vmem_to_hbm [thread:$0]  %s354_s19, 128, %s812_s5, [#allocation3]  }
 0x142   :  { %534 = dma.done.wait [#allocation3], 128  }
 0x143   :  { %535 = vsyncadd [#allocation3], 4294967168 }
 0x144   :  { %360 = vsyncpa [#allocation3], 1 }

</bundles_post_ra>
